<compile_context>
chip_gen: v7x
topology: tpu7x:2x2x1
jax: 0.10.0
libtpu: 0.0.40
codegen_flags: <defaults>
</compile_context>

<pallas_src>
import functools

import jax
import jax.numpy as jnp
from jax import lax
from jax.experimental import pallas as pl
from jax.experimental.pallas import tpu as pltpu


def _attention_kernel(x_ref, wqkv_ref, wproj_ref, bproj_ref, o_ref,
                      qkv_ref, heads_ref, *, num_heads, head_dim, group,
                      seq_len):
    # x_ref:     (G, N, C)   bf16, streamed per grid step
    # wqkv_ref:  (C, 3C)     bf16, q-columns pre-scaled by head_dim**-0.5 (resident)
    # wproj_ref: (C, C)      bf16 (resident)
    # bproj_ref: (1, C)      f32  (resident)
    # o_ref:     (G, N, C)   output dtype
    # qkv_ref:   (G*N, 3C)   bf16 VMEM scratch (staged qkv projection)
    # heads_ref: (G*N, C)    bf16 VMEM scratch (concatenated head outputs)
    C = num_heads * head_dim
    GN = group * seq_len

    # Fused qkv projection over the flattened (G*N, C) rows (K = C, full MXU
    # depth).  Stage the result into bf16 scratch so the big intermediate is
    # not kept live in f32 across the unrolled head loop.
    x = x_ref[...].reshape(GN, C)                                   # bf16
    qkv_ref[...] = jnp.dot(
        x, wqkv_ref[...],
        preferred_element_type=jnp.float32).astype(jnp.bfloat16)    # (G*N, 3C)

    # Column layout of qkv matches torch's reshape (N, 3, H, Dh):
    #   q -> cols [0, C), k -> cols [C, 2C), v -> cols [2C, 3C)
    #   head h within each chunk -> cols [h*Dh, (h+1)*Dh)
    for g in range(group):
        r = g * seq_len
        for h in range(num_heads):
            lo = h * head_dim
            qh = qkv_ref[r:r + seq_len, lo:lo + head_dim]                   # (N, Dh)
            kh = qkv_ref[r:r + seq_len, C + lo:C + lo + head_dim]           # (N, Dh)
            vh = qkv_ref[r:r + seq_len, 2 * C + lo:2 * C + lo + head_dim]   # (N, Dh)

            # scores = q @ k^T  (softmax scale already folded into Wqkv q-cols)
            s = lax.dot_general(qh, kh, (((1,), (1,)), ((), ())),
                                preferred_element_type=jnp.float32)         # (N, N)

            # numerically-stable softmax over the last axis, f32 statistics
            s = s - jnp.max(s, axis=-1, keepdims=True)
            p = jnp.exp(s)
            p = p * pl.reciprocal(jnp.sum(p, axis=-1, keepdims=True),
                                  approx=True)

            # attn @ v; write the head output straight into its column slot
            oh = jnp.dot(p.astype(jnp.bfloat16), vh,
                         preferred_element_type=jnp.float32)                # (N, Dh)
            heads_ref[r:r + seq_len, lo:lo + head_dim] = oh.astype(jnp.bfloat16)

    # Output projection on the concatenated heads (K = C), bias, store.
    y = jnp.dot(heads_ref[...], wproj_ref[...],
                preferred_element_type=jnp.float32)                         # (G*N, C)
    y = y + bproj_ref[...]
    o_ref[...] = y.reshape(group, seq_len, C).astype(o_ref.dtype)


def _vmem_limit_bytes():
    """Generation-aware scoped-VMEM limit: ~70% of physical VMEM."""
    try:
        cap = pltpu.get_tpu_info().vmem_capacity_bytes
    except Exception:
        cap = 64 * 1024 * 1024  # conservative fallback (v7x-sized)
    return int(0.7 * cap)


def _per_step_vmem_bytes(g, n, c):
    """Rough per-grid-step VMEM footprint for a batch group of g elements."""
    bf16, f32 = 2, 4
    x_blk = 2 * g * n * c * bf16                 # double-buffered input block
    o_blk = 2 * g * n * c * f32                  # double-buffered output block
    qkv_s = g * n * 3 * c * bf16                 # staged qkv scratch
    head_s = g * n * c * bf16                    # concatenated-heads scratch
    weights = (3 * c * c + c * c) * bf16 + c * f32   # single-buffered constants
    live = g * n * 3 * c * f32 + g * n * c * f32 + 2 * n * n * f32
    return x_blk + o_blk + qkv_s + head_s + weights + live


def _pick_group(batch, n, c, vmem_limit):
    """Largest divisor of `batch` whose per-step footprint fits the budget."""
    for g in range(batch, 0, -1):
        if batch % g == 0 and _per_step_vmem_bytes(g, n, c) <= 0.5 * vmem_limit:
            return g
    return 1


def attention_forward(x, wqkv, wproj, bproj, *, num_heads):
    B, N, C = x.shape
    head_dim = C // num_heads
    scale = head_dim ** (-0.5)
    out_dtype = x.dtype

    vmem_limit = _vmem_limit_bytes()
    group = _pick_group(B, N, C, vmem_limit)

    # Host-side prep: fold the softmax scale into the q third of Wqkv and cast
    # every MXU operand (including the streamed activations) to bf16.
    scale_cols = jnp.concatenate(
        [jnp.full((C,), scale, dtype=wqkv.dtype),
         jnp.ones((2 * C,), dtype=wqkv.dtype)])
    wqkv_b = (wqkv * scale_cols[None, :]).astype(jnp.bfloat16)
    wproj_b = wproj.astype(jnp.bfloat16)
    bproj_f = bproj.astype(jnp.float32)
    x_b = x.astype(jnp.bfloat16)

    kernel = functools.partial(_attention_kernel,
                               num_heads=num_heads,
                               head_dim=head_dim,
                               group=group,
                               seq_len=N)

    return pl.pallas_call(
        kernel,
        out_shape=jax.ShapeDtypeStruct((B, N, C), out_dtype),
        grid_spec=pltpu.PrefetchScalarGridSpec(
            num_scalar_prefetch=0,
            grid=(B // group,),
            in_specs=[
                pl.BlockSpec((group, N, C), lambda b: (b, 0, 0)),
                # Constant operands: never re-fetched, so single-buffer them.
                pl.BlockSpec((C, 3 * C), lambda b: (0, 0),
                             pipeline_mode=pl.Buffered(1)),
                pl.BlockSpec((C, C), lambda b: (0, 0),
                             pipeline_mode=pl.Buffered(1)),
                pl.BlockSpec((1, C), lambda b: (0, 0),
                             pipeline_mode=pl.Buffered(1)),
            ],
            out_specs=pl.BlockSpec((group, N, C), lambda b: (b, 0, 0)),
            scratch_shapes=[
                pltpu.VMEM((group * N, 3 * C), jnp.bfloat16),
                pltpu.VMEM((group * N, C), jnp.bfloat16),
            ],
        ),
        compiler_params=pltpu.CompilerParams(
            dimension_semantics=("parallel",),
            vmem_limit_bytes=vmem_limit),
    )(x_b, wqkv_b, wproj_b, bproj_f)


def attention_reference(x, wqkv, wproj, bproj, *, num_heads):
    """Pure-JAX (f32) reference mirroring the PyTorch forward."""
    B, N, C = x.shape
    head_dim = C // num_heads
    scale = head_dim ** (-0.5)
    qkv = jnp.einsum("bnc,cd->bnd", x, wqkv)                       # (B,N,3C)
    qkv = qkv.reshape(B, N, 3, num_heads, head_dim)
    qkv = jnp.transpose(qkv, (2, 0, 3, 1, 4))                      # (3,B,H,N,Dh)
    q, k, v = qkv[0], qkv[1], qkv[2]
    attn = jnp.einsum("bhnd,bhmd->bhnm", q, k) * scale
    attn = jax.nn.softmax(attn, axis=-1)
    out = jnp.einsum("bhnm,bhmd->bhnd", attn, v)                   # (B,H,N,Dh)
    out = jnp.transpose(out, (0, 2, 1, 3)).reshape(B, N, C)
    return jnp.einsum("bnc,cd->bnd", out, wproj) + bproj[None, :, :]


if __name__ == "__main__":
    # Small shapes consistent with the module's forward: x is (B, N, C).
    B, N, C = 2, 8, 32
    num_heads = 4

    key = jax.random.PRNGKey(0)
    kx, kw1, kw2, kb = jax.random.split(key, 4)

    x = jax.random.normal(kx, (B, N, C), dtype=jnp.float32)
    # Deterministic synthetic parameters (qkv has no bias: qkv_bias=False).
    wqkv = 0.02 * jax.random.normal(kw1, (C, 3 * C), dtype=jnp.float32)
    wproj = 0.02 * jax.random.normal(kw2, (C, C), dtype=jnp.float32)
    bproj = 0.02 * jax.random.normal(kb, (1, C), dtype=jnp.float32)

    y = attention_forward(x, wqkv, wproj, bproj, num_heads=num_heads)
    y = jax.block_until_ready(y)

    y_ref = attention_reference(x, wqkv, wproj, bproj, num_heads=num_heads)
    assert y.shape == (B, N, C)
    # bf16 MXU operands (f32 accumulation) -> relaxed tolerance vs f32 reference.
    assert jnp.allclose(y, y_ref, atol=2e-2, rtol=2e-2), "mismatch vs reference"

    print("KERNEL_OK")
</pallas_src>

<mosaic_0001>
module attributes {stable_mosaic.version = 11 : i64} {
  func.func @_attention_kernel(%arg0: i32, %arg1: memref<2x8x32xbf16, #tpu.memory_space<vmem>>, %arg2: memref<32x96xbf16, #tpu.memory_space<vmem>>, %arg3: memref<32x32xbf16, #tpu.memory_space<vmem>>, %arg4: memref<1x32xf32, #tpu.memory_space<vmem>>, %arg5: memref<2x8x32xf32, #tpu.memory_space<vmem>>, %arg6: memref<16x96xbf16, #tpu.memory_space<vmem>>, %arg7: memref<16x32xbf16, #tpu.memory_space<vmem>>) attributes {dimension_semantics = [#tpu.dimension_semantics<parallel>], iteration_bounds = array<i64: 1>, scalar_prefetch = 0 : i64, scratch_operands = 2 : i64, tpu.core_type = #tpu.core_type<tc>, window_params = [{transform_indices = @transform_0, window_bounds = array<i64: 2, 8, 32>}, {pipeline_mode = #tpu.pipeline_mode<synchronous>, transform_indices = @transform_1, window_bounds = array<i64: 32, 96>}, {pipeline_mode = #tpu.pipeline_mode<synchronous>, transform_indices = @transform_2, window_bounds = array<i64: 32, 32>}, {pipeline_mode = #tpu.pipeline_mode<synchronous>, transform_indices = @transform_3, window_bounds = array<i64: 1, 32>}, {transform_indices = @transform_4, window_bounds = array<i64: 2, 8, 32>}]} {
    %c0 = arith.constant 0 : index
    %c0_0 = arith.constant 0 : index
    %c0_1 = arith.constant 0 : index
    %0 = vector.load %arg1[%c0, %c0_0, %c0_1] : memref<2x8x32xbf16, #tpu.memory_space<vmem>>, vector<2x8x32xbf16>
    %1 = vector.shape_cast %0 : vector<2x8x32xbf16> to vector<16x32xbf16>
    %c0_2 = arith.constant 0 : index
    %c0_3 = arith.constant 0 : index
    %2 = vector.load %arg2[%c0_2, %c0_3] : memref<32x96xbf16, #tpu.memory_space<vmem>>, vector<32x96xbf16>
    %cst = arith.constant dense<0.000000e+00> : vector<16x96xf32>
    %3 = tpu.matmul %1, %2, %cst {dimension_numbers = #tpu.dot_dimension_numbers<[1], [0], [0], [1], [0, 0, 1, 1], [], []>} : vector<16x32xbf16>, vector<32x96xbf16>, vector<16x96xf32> -> vector<16x96xf32>
    %4 = arith.truncf %3 : vector<16x96xf32> to vector<16x96xbf16>
    %c0_4 = arith.constant 0 : index
    %c0_5 = arith.constant 0 : index
    %5 = vector.load %arg6[%c0_4, %c0_5] : memref<16x96xbf16, #tpu.memory_space<vmem>>, vector<16x96xbf16>
    tpu.vector_store %arg6[%c0_4, %c0_5], %4 {strides = array<i32>} : memref<16x96xbf16, #tpu.memory_space<vmem>>, vector<16x96xbf16>,
    %c0_6 = arith.constant 0 : index
    %c0_7 = arith.constant 0 : index
    %6 = vector.load %arg6[%c0_6, %c0_7] : memref<16x96xbf16, #tpu.memory_space<vmem>>, vector<8x8xbf16>
    %c0_8 = arith.constant 0 : index
    %c32 = arith.constant 32 : index
    %7 = vector.load %arg6[%c0_8, %c32] : memref<16x96xbf16, #tpu.memory_space<vmem>>, vector<8x8xbf16>
    %c0_9 = arith.constant 0 : index
    %c64 = arith.constant 64 : index
    %8 = vector.load %arg6[%c0_9, %c64] : memref<16x96xbf16, #tpu.memory_space<vmem>>, vector<8x8xbf16>
    %cst_10 = arith.constant dense<0.000000e+00> : vector<8x8xf32>
    %9 = tpu.matmul %6, %7, %cst_10 {dimension_numbers = #tpu.dot_dimension_numbers<[1], [1], [0], [0], [0, 0, 1, 0], [], []>} : vector<8x8xbf16>, vector<8x8xbf16>, vector<8x8xf32> -> vector<8x8xf32>
    %cst_11 = arith.constant dense<0xFF800000> : vector<8xf32>
    %10 = vector.multi_reduction <maximumf>, %9, %cst_11 [1] : vector<8x8xf32> to vector<8xf32>
    %11 = vector.shape_cast %10 : vector<8xf32> to vector<8x1xf32>
    %12 = vector.broadcast %11 : vector<8x1xf32> to vector<8x8xf32>
    %13 = arith.subf %9, %12 : vector<8x8xf32>
    %14 = math.exp %13 : vector<8x8xf32>
    %cst_12 = arith.constant dense<0.000000e+00> : vector<8xf32>
    %15 = vector.multi_reduction <add>, %14, %cst_12 [1] : vector<8x8xf32> to vector<8xf32>
    %16 = vector.shape_cast %15 : vector<8xf32> to vector<8x1xf32>
    %17 = tpu.reciprocal %16 {approx = true} : vector<8x1xf32> -> vector<8x1xf32>
    %18 = vector.broadcast %17 : vector<8x1xf32> to vector<8x8xf32>
    %19 = arith.mulf %14, %18 : vector<8x8xf32>
    %20 = arith.truncf %19 : vector<8x8xf32> to vector<8x8xbf16>
    %cst_13 = arith.constant dense<0.000000e+00> : vector<8x8xf32>
    %21 = tpu.matmul %20, %8, %cst_13 {dimension_numbers = #tpu.dot_dimension_numbers<[1], [0], [0], [1], [0, 0, 1, 1], [], []>} : vector<8x8xbf16>, vector<8x8xbf16>, vector<8x8xf32> -> vector<8x8xf32>
    %22 = arith.truncf %21 : vector<8x8xf32> to vector<8x8xbf16>
    %c0_14 = arith.constant 0 : index
    %c0_15 = arith.constant 0 : index
    %23 = vector.load %arg7[%c0_14, %c0_15] : memref<16x32xbf16, #tpu.memory_space<vmem>>, vector<8x8xbf16>
    tpu.vector_store %arg7[%c0_14, %c0_15], %22 {strides = array<i32>} : memref<16x32xbf16, #tpu.memory_space<vmem>>, vector<8x8xbf16>,
    %c0_16 = arith.constant 0 : index
    %c8 = arith.constant 8 : index
    %24 = vector.load %arg6[%c0_16, %c8] : memref<16x96xbf16, #tpu.memory_space<vmem>>, vector<8x8xbf16>
    %c0_17 = arith.constant 0 : index
    %c40 = arith.constant 40 : index
    %25 = vector.load %arg6[%c0_17, %c40] : memref<16x96xbf16, #tpu.memory_space<vmem>>, vector<8x8xbf16>
    %c0_18 = arith.constant 0 : index
    %c72 = arith.constant 72 : index
    %26 = vector.load %arg6[%c0_18, %c72] : memref<16x96xbf16, #tpu.memory_space<vmem>>, vector<8x8xbf16>
    %cst_19 = arith.constant dense<0.000000e+00> : vector<8x8xf32>
    %27 = tpu.matmul %24, %25, %cst_19 {dimension_numbers = #tpu.dot_dimension_numbers<[1], [1], [0], [0], [0, 0, 1, 0], [], []>} : vector<8x8xbf16>, vector<8x8xbf16>, vector<8x8xf32> -> vector<8x8xf32>
    %cst_20 = arith.constant dense<0xFF800000> : vector<8xf32>
    %28 = vector.multi_reduction <maximumf>, %27, %cst_20 [1] : vector<8x8xf32> to vector<8xf32>
    %29 = vector.shape_cast %28 : vector<8xf32> to vector<8x1xf32>
    %30 = vector.broadcast %29 : vector<8x1xf32> to vector<8x8xf32>
    %31 = arith.subf %27, %30 : vector<8x8xf32>
    %32 = math.exp %31 : vector<8x8xf32>
    %cst_21 = arith.constant dense<0.000000e+00> : vector<8xf32>
    %33 = vector.multi_reduction <add>, %32, %cst_21 [1] : vector<8x8xf32> to vector<8xf32>
    %34 = vector.shape_cast %33 : vector<8xf32> to vector<8x1xf32>
    %35 = tpu.reciprocal %34 {approx = true} : vector<8x1xf32> -> vector<8x1xf32>
    %36 = vector.broadcast %35 : vector<8x1xf32> to vector<8x8xf32>
    %37 = arith.mulf %32, %36 : vector<8x8xf32>
    %38 = arith.truncf %37 : vector<8x8xf32> to vector<8x8xbf16>
    %cst_22 = arith.constant dense<0.000000e+00> : vector<8x8xf32>
    %39 = tpu.matmul %38, %26, %cst_22 {dimension_numbers = #tpu.dot_dimension_numbers<[1], [0], [0], [1], [0, 0, 1, 1], [], []>} : vector<8x8xbf16>, vector<8x8xbf16>, vector<8x8xf32> -> vector<8x8xf32>
    %40 = arith.truncf %39 : vector<8x8xf32> to vector<8x8xbf16>
    %c0_23 = arith.constant 0 : index
    %c8_24 = arith.constant 8 : index
    %41 = vector.load %arg7[%c0_23, %c8_24] : memref<16x32xbf16, #tpu.memory_space<vmem>>, vector<8x8xbf16>
    tpu.vector_store %arg7[%c0_23, %c8_24], %40 {strides = array<i32>} : memref<16x32xbf16, #tpu.memory_space<vmem>>, vector<8x8xbf16>,
    %c0_25 = arith.constant 0 : index
    %c16 = arith.constant 16 : index
    %42 = vector.load %arg6[%c0_25, %c16] : memref<16x96xbf16, #tpu.memory_space<vmem>>, vector<8x8xbf16>
    %c0_26 = arith.constant 0 : index
    %c48 = arith.constant 48 : index
    %43 = vector.load %arg6[%c0_26, %c48] : memref<16x96xbf16, #tpu.memory_space<vmem>>, vector<8x8xbf16>
    %c0_27 = arith.constant 0 : index
    %c80 = arith.constant 80 : index
    %44 = vector.load %arg6[%c0_27, %c80] : memref<16x96xbf16, #tpu.memory_space<vmem>>, vector<8x8xbf16>
    %cst_28 = arith.constant dense<0.000000e+00> : vector<8x8xf32>
    %45 = tpu.matmul %42, %43, %cst_28 {dimension_numbers = #tpu.dot_dimension_numbers<[1], [1], [0], [0], [0, 0, 1, 0], [], []>} : vector<8x8xbf16>, vector<8x8xbf16>, vector<8x8xf32> -> vector<8x8xf32>
    %cst_29 = arith.constant dense<0xFF800000> : vector<8xf32>
    %46 = vector.multi_reduction <maximumf>, %45, %cst_29 [1] : vector<8x8xf32> to vector<8xf32>
    %47 = vector.shape_cast %46 : vector<8xf32> to vector<8x1xf32>
    %48 = vector.broadcast %47 : vector<8x1xf32> to vector<8x8xf32>
    %49 = arith.subf %45, %48 : vector<8x8xf32>
    %50 = math.exp %49 : vector<8x8xf32>
    %cst_30 = arith.constant dense<0.000000e+00> : vector<8xf32>
    %51 = vector.multi_reduction <add>, %50, %cst_30 [1] : vector<8x8xf32> to vector<8xf32>
    %52 = vector.shape_cast %51 : vector<8xf32> to vector<8x1xf32>
    %53 = tpu.reciprocal %52 {approx = true} : vector<8x1xf32> -> vector<8x1xf32>
    %54 = vector.broadcast %53 : vector<8x1xf32> to vector<8x8xf32>
    %55 = arith.mulf %50, %54 : vector<8x8xf32>
    %56 = arith.truncf %55 : vector<8x8xf32> to vector<8x8xbf16>
    %cst_31 = arith.constant dense<0.000000e+00> : vector<8x8xf32>
    %57 = tpu.matmul %56, %44, %cst_31 {dimension_numbers = #tpu.dot_dimension_numbers<[1], [0], [0], [1], [0, 0, 1, 1], [], []>} : vector<8x8xbf16>, vector<8x8xbf16>, vector<8x8xf32> -> vector<8x8xf32>
    %58 = arith.truncf %57 : vector<8x8xf32> to vector<8x8xbf16>
    %c0_32 = arith.constant 0 : index
    %c16_33 = arith.constant 16 : index
    %59 = vector.load %arg7[%c0_32, %c16_33] : memref<16x32xbf16, #tpu.memory_space<vmem>>, vector<8x8xbf16>
    tpu.vector_store %arg7[%c0_32, %c16_33], %58 {strides = array<i32>} : memref<16x32xbf16, #tpu.memory_space<vmem>>, vector<8x8xbf16>,
    %c0_34 = arith.constant 0 : index
    %c24 = arith.constant 24 : index
    %60 = vector.load %arg6[%c0_34, %c24] : memref<16x96xbf16, #tpu.memory_space<vmem>>, vector<8x8xbf16>
    %c0_35 = arith.constant 0 : index
    %c56 = arith.constant 56 : index
    %61 = vector.load %arg6[%c0_35, %c56] : memref<16x96xbf16, #tpu.memory_space<vmem>>, vector<8x8xbf16>
    %c0_36 = arith.constant 0 : index
    %c88 = arith.constant 88 : index
    %62 = vector.load %arg6[%c0_36, %c88] : memref<16x96xbf16, #tpu.memory_space<vmem>>, vector<8x8xbf16>
    %cst_37 = arith.constant dense<0.000000e+00> : vector<8x8xf32>
    %63 = tpu.matmul %60, %61, %cst_37 {dimension_numbers = #tpu.dot_dimension_numbers<[1], [1], [0], [0], [0, 0, 1, 0], [], []>} : vector<8x8xbf16>, vector<8x8xbf16>, vector<8x8xf32> -> vector<8x8xf32>
    %cst_38 = arith.constant dense<0xFF800000> : vector<8xf32>
    %64 = vector.multi_reduction <maximumf>, %63, %cst_38 [1] : vector<8x8xf32> to vector<8xf32>
    %65 = vector.shape_cast %64 : vector<8xf32> to vector<8x1xf32>
    %66 = vector.broadcast %65 : vector<8x1xf32> to vector<8x8xf32>
    %67 = arith.subf %63, %66 : vector<8x8xf32>
    %68 = math.exp %67 : vector<8x8xf32>
    %cst_39 = arith.constant dense<0.000000e+00> : vector<8xf32>
    %69 = vector.multi_reduction <add>, %68, %cst_39 [1] : vector<8x8xf32> to vector<8xf32>
    %70 = vector.shape_cast %69 : vector<8xf32> to vector<8x1xf32>
    %71 = tpu.reciprocal %70 {approx = true} : vector<8x1xf32> -> vector<8x1xf32>
    %72 = vector.broadcast %71 : vector<8x1xf32> to vector<8x8xf32>
    %73 = arith.mulf %68, %72 : vector<8x8xf32>
    %74 = arith.truncf %73 : vector<8x8xf32> to vector<8x8xbf16>
    %cst_40 = arith.constant dense<0.000000e+00> : vector<8x8xf32>
    %75 = tpu.matmul %74, %62, %cst_40 {dimension_numbers = #tpu.dot_dimension_numbers<[1], [0], [0], [1], [0, 0, 1, 1], [], []>} : vector<8x8xbf16>, vector<8x8xbf16>, vector<8x8xf32> -> vector<8x8xf32>
    %76 = arith.truncf %75 : vector<8x8xf32> to vector<8x8xbf16>
    %c0_41 = arith.constant 0 : index
    %c24_42 = arith.constant 24 : index
    %77 = vector.load %arg7[%c0_41, %c24_42] : memref<16x32xbf16, #tpu.memory_space<vmem>>, vector<8x8xbf16>
    tpu.vector_store %arg7[%c0_41, %c24_42], %76 {strides = array<i32>} : memref<16x32xbf16, #tpu.memory_space<vmem>>, vector<8x8xbf16>,
    %c8_43 = arith.constant 8 : index
    %c0_44 = arith.constant 0 : index
    %78 = vector.load %arg6[%c8_43, %c0_44] : memref<16x96xbf16, #tpu.memory_space<vmem>>, vector<8x8xbf16>
    %c8_45 = arith.constant 8 : index
    %c32_46 = arith.constant 32 : index
    %79 = vector.load %arg6[%c8_45, %c32_46] : memref<16x96xbf16, #tpu.memory_space<vmem>>, vector<8x8xbf16>
    %c8_47 = arith.constant 8 : index
    %c64_48 = arith.constant 64 : index
    %80 = vector.load %arg6[%c8_47, %c64_48] : memref<16x96xbf16, #tpu.memory_space<vmem>>, vector<8x8xbf16>
    %cst_49 = arith.constant dense<0.000000e+00> : vector<8x8xf32>
    %81 = tpu.matmul %78, %79, %cst_49 {dimension_numbers = #tpu.dot_dimension_numbers<[1], [1], [0], [0], [0, 0, 1, 0], [], []>} : vector<8x8xbf16>, vector<8x8xbf16>, vector<8x8xf32> -> vector<8x8xf32>
    %cst_50 = arith.constant dense<0xFF800000> : vector<8xf32>
    %82 = vector.multi_reduction <maximumf>, %81, %cst_50 [1] : vector<8x8xf32> to vector<8xf32>
    %83 = vector.shape_cast %82 : vector<8xf32> to vector<8x1xf32>
    %84 = vector.broadcast %83 : vector<8x1xf32> to vector<8x8xf32>
    %85 = arith.subf %81, %84 : vector<8x8xf32>
    %86 = math.exp %85 : vector<8x8xf32>
    %cst_51 = arith.constant dense<0.000000e+00> : vector<8xf32>
    %87 = vector.multi_reduction <add>, %86, %cst_51 [1] : vector<8x8xf32> to vector<8xf32>
    %88 = vector.shape_cast %87 : vector<8xf32> to vector<8x1xf32>
    %89 = tpu.reciprocal %88 {approx = true} : vector<8x1xf32> -> vector<8x1xf32>
    %90 = vector.broadcast %89 : vector<8x1xf32> to vector<8x8xf32>
    %91 = arith.mulf %86, %90 : vector<8x8xf32>
    %92 = arith.truncf %91 : vector<8x8xf32> to vector<8x8xbf16>
    %cst_52 = arith.constant dense<0.000000e+00> : vector<8x8xf32>
    %93 = tpu.matmul %92, %80, %cst_52 {dimension_numbers = #tpu.dot_dimension_numbers<[1], [0], [0], [1], [0, 0, 1, 1], [], []>} : vector<8x8xbf16>, vector<8x8xbf16>, vector<8x8xf32> -> vector<8x8xf32>
    %94 = arith.truncf %93 : vector<8x8xf32> to vector<8x8xbf16>
    %c8_53 = arith.constant 8 : index
    %c0_54 = arith.constant 0 : index
    %95 = vector.load %arg7[%c8_53, %c0_54] : memref<16x32xbf16, #tpu.memory_space<vmem>>, vector<8x8xbf16>
    tpu.vector_store %arg7[%c8_53, %c0_54], %94 {strides = array<i32>} : memref<16x32xbf16, #tpu.memory_space<vmem>>, vector<8x8xbf16>,
    %c8_55 = arith.constant 8 : index
    %c8_56 = arith.constant 8 : index
    %96 = vector.load %arg6[%c8_55, %c8_56] : memref<16x96xbf16, #tpu.memory_space<vmem>>, vector<8x8xbf16>
    %c8_57 = arith.constant 8 : index
    %c40_58 = arith.constant 40 : index
    %97 = vector.load %arg6[%c8_57, %c40_58] : memref<16x96xbf16, #tpu.memory_space<vmem>>, vector<8x8xbf16>
    %c8_59 = arith.constant 8 : index
    %c72_60 = arith.constant 72 : index
    %98 = vector.load %arg6[%c8_59, %c72_60] : memref<16x96xbf16, #tpu.memory_space<vmem>>, vector<8x8xbf16>
    %cst_61 = arith.constant dense<0.000000e+00> : vector<8x8xf32>
    %99 = tpu.matmul %96, %97, %cst_61 {dimension_numbers = #tpu.dot_dimension_numbers<[1], [1], [0], [0], [0, 0, 1, 0], [], []>} : vector<8x8xbf16>, vector<8x8xbf16>, vector<8x8xf32> -> vector<8x8xf32>
    %cst_62 = arith.constant dense<0xFF800000> : vector<8xf32>
    %100 = vector.multi_reduction <maximumf>, %99, %cst_62 [1] : vector<8x8xf32> to vector<8xf32>
    %101 = vector.shape_cast %100 : vector<8xf32> to vector<8x1xf32>
    %102 = vector.broadcast %101 : vector<8x1xf32> to vector<8x8xf32>
    %103 = arith.subf %99, %102 : vector<8x8xf32>
    %104 = math.exp %103 : vector<8x8xf32>
    %cst_63 = arith.constant dense<0.000000e+00> : vector<8xf32>
    %105 = vector.multi_reduction <add>, %104, %cst_63 [1] : vector<8x8xf32> to vector<8xf32>
    %106 = vector.shape_cast %105 : vector<8xf32> to vector<8x1xf32>
    %107 = tpu.reciprocal %106 {approx = true} : vector<8x1xf32> -> vector<8x1xf32>
    %108 = vector.broadcast %107 : vector<8x1xf32> to vector<8x8xf32>
    %109 = arith.mulf %104, %108 : vector<8x8xf32>
    %110 = arith.truncf %109 : vector<8x8xf32> to vector<8x8xbf16>
    %cst_64 = arith.constant dense<0.000000e+00> : vector<8x8xf32>
    %111 = tpu.matmul %110, %98, %cst_64 {dimension_numbers = #tpu.dot_dimension_numbers<[1], [0], [0], [1], [0, 0, 1, 1], [], []>} : vector<8x8xbf16>, vector<8x8xbf16>, vector<8x8xf32> -> vector<8x8xf32>
    %112 = arith.truncf %111 : vector<8x8xf32> to vector<8x8xbf16>
    %c8_65 = arith.constant 8 : index
    %c8_66 = arith.constant 8 : index
    %113 = vector.load %arg7[%c8_65, %c8_66] : memref<16x32xbf16, #tpu.memory_space<vmem>>, vector<8x8xbf16>
    tpu.vector_store %arg7[%c8_65, %c8_66], %112 {strides = array<i32>} : memref<16x32xbf16, #tpu.memory_space<vmem>>, vector<8x8xbf16>,
    %c8_67 = arith.constant 8 : index
    %c16_68 = arith.constant 16 : index
    %114 = vector.load %arg6[%c8_67, %c16_68] : memref<16x96xbf16, #tpu.memory_space<vmem>>, vector<8x8xbf16>
    %c8_69 = arith.constant 8 : index
    %c48_70 = arith.constant 48 : index
    %115 = vector.load %arg6[%c8_69, %c48_70] : memref<16x96xbf16, #tpu.memory_space<vmem>>, vector<8x8xbf16>
    %c8_71 = arith.constant 8 : index
    %c80_72 = arith.constant 80 : index
    %116 = vector.load %arg6[%c8_71, %c80_72] : memref<16x96xbf16, #tpu.memory_space<vmem>>, vector<8x8xbf16>
    %cst_73 = arith.constant dense<0.000000e+00> : vector<8x8xf32>
    %117 = tpu.matmul %114, %115, %cst_73 {dimension_numbers = #tpu.dot_dimension_numbers<[1], [1], [0], [0], [0, 0, 1, 0], [], []>} : vector<8x8xbf16>, vector<8x8xbf16>, vector<8x8xf32> -> vector<8x8xf32>
    %cst_74 = arith.constant dense<0xFF800000> : vector<8xf32>
    %118 = vector.multi_reduction <maximumf>, %117, %cst_74 [1] : vector<8x8xf32> to vector<8xf32>
    %119 = vector.shape_cast %118 : vector<8xf32> to vector<8x1xf32>
    %120 = vector.broadcast %119 : vector<8x1xf32> to vector<8x8xf32>
    %121 = arith.subf %117, %120 : vector<8x8xf32>
    %122 = math.exp %121 : vector<8x8xf32>
    %cst_75 = arith.constant dense<0.000000e+00> : vector<8xf32>
    %123 = vector.multi_reduction <add>, %122, %cst_75 [1] : vector<8x8xf32> to vector<8xf32>
    %124 = vector.shape_cast %123 : vector<8xf32> to vector<8x1xf32>
    %125 = tpu.reciprocal %124 {approx = true} : vector<8x1xf32> -> vector<8x1xf32>
    %126 = vector.broadcast %125 : vector<8x1xf32> to vector<8x8xf32>
    %127 = arith.mulf %122, %126 : vector<8x8xf32>
    %128 = arith.truncf %127 : vector<8x8xf32> to vector<8x8xbf16>
    %cst_76 = arith.constant dense<0.000000e+00> : vector<8x8xf32>
    %129 = tpu.matmul %128, %116, %cst_76 {dimension_numbers = #tpu.dot_dimension_numbers<[1], [0], [0], [1], [0, 0, 1, 1], [], []>} : vector<8x8xbf16>, vector<8x8xbf16>, vector<8x8xf32> -> vector<8x8xf32>
    %130 = arith.truncf %129 : vector<8x8xf32> to vector<8x8xbf16>
    %c8_77 = arith.constant 8 : index
    %c16_78 = arith.constant 16 : index
    %131 = vector.load %arg7[%c8_77, %c16_78] : memref<16x32xbf16, #tpu.memory_space<vmem>>, vector<8x8xbf16>
    tpu.vector_store %arg7[%c8_77, %c16_78], %130 {strides = array<i32>} : memref<16x32xbf16, #tpu.memory_space<vmem>>, vector<8x8xbf16>,
    %c8_79 = arith.constant 8 : index
    %c24_80 = arith.constant 24 : index
    %132 = vector.load %arg6[%c8_79, %c24_80] : memref<16x96xbf16, #tpu.memory_space<vmem>>, vector<8x8xbf16>
    %c8_81 = arith.constant 8 : index
    %c56_82 = arith.constant 56 : index
    %133 = vector.load %arg6[%c8_81, %c56_82] : memref<16x96xbf16, #tpu.memory_space<vmem>>, vector<8x8xbf16>
    %c8_83 = arith.constant 8 : index
    %c88_84 = arith.constant 88 : index
    %134 = vector.load %arg6[%c8_83, %c88_84] : memref<16x96xbf16, #tpu.memory_space<vmem>>, vector<8x8xbf16>
    %cst_85 = arith.constant dense<0.000000e+00> : vector<8x8xf32>
    %135 = tpu.matmul %132, %133, %cst_85 {dimension_numbers = #tpu.dot_dimension_numbers<[1], [1], [0], [0], [0, 0, 1, 0], [], []>} : vector<8x8xbf16>, vector<8x8xbf16>, vector<8x8xf32> -> vector<8x8xf32>
    %cst_86 = arith.constant dense<0xFF800000> : vector<8xf32>
    %136 = vector.multi_reduction <maximumf>, %135, %cst_86 [1] : vector<8x8xf32> to vector<8xf32>
    %137 = vector.shape_cast %136 : vector<8xf32> to vector<8x1xf32>
    %138 = vector.broadcast %137 : vector<8x1xf32> to vector<8x8xf32>
    %139 = arith.subf %135, %138 : vector<8x8xf32>
    %140 = math.exp %139 : vector<8x8xf32>
    %cst_87 = arith.constant dense<0.000000e+00> : vector<8xf32>
    %141 = vector.multi_reduction <add>, %140, %cst_87 [1] : vector<8x8xf32> to vector<8xf32>
    %142 = vector.shape_cast %141 : vector<8xf32> to vector<8x1xf32>
    %143 = tpu.reciprocal %142 {approx = true} : vector<8x1xf32> -> vector<8x1xf32>
    %144 = vector.broadcast %143 : vector<8x1xf32> to vector<8x8xf32>
    %145 = arith.mulf %140, %144 : vector<8x8xf32>
    %146 = arith.truncf %145 : vector<8x8xf32> to vector<8x8xbf16>
    %cst_88 = arith.constant dense<0.000000e+00> : vector<8x8xf32>
    %147 = tpu.matmul %146, %134, %cst_88 {dimension_numbers = #tpu.dot_dimension_numbers<[1], [0], [0], [1], [0, 0, 1, 1], [], []>} : vector<8x8xbf16>, vector<8x8xbf16>, vector<8x8xf32> -> vector<8x8xf32>
    %148 = arith.truncf %147 : vector<8x8xf32> to vector<8x8xbf16>
    %c8_89 = arith.constant 8 : index
    %c24_90 = arith.constant 24 : index
    %149 = vector.load %arg7[%c8_89, %c24_90] : memref<16x32xbf16, #tpu.memory_space<vmem>>, vector<8x8xbf16>
    tpu.vector_store %arg7[%c8_89, %c24_90], %148 {strides = array<i32>} : memref<16x32xbf16, #tpu.memory_space<vmem>>, vector<8x8xbf16>,
    %c0_91 = arith.constant 0 : index
    %c0_92 = arith.constant 0 : index
    %150 = vector.load %arg7[%c0_91, %c0_92] : memref<16x32xbf16, #tpu.memory_space<vmem>>, vector<16x32xbf16>
    %c0_93 = arith.constant 0 : index
    %c0_94 = arith.constant 0 : index
    %151 = vector.load %arg3[%c0_93, %c0_94] : memref<32x32xbf16, #tpu.memory_space<vmem>>, vector<32x32xbf16>
    %cst_95 = arith.constant dense<0.000000e+00> : vector<16x32xf32>
    %152 = tpu.matmul %150, %151, %cst_95 {dimension_numbers = #tpu.dot_dimension_numbers<[1], [0], [0], [1], [0, 0, 1, 1], [], []>} : vector<16x32xbf16>, vector<32x32xbf16>, vector<16x32xf32> -> vector<16x32xf32>
    %c0_96 = arith.constant 0 : index
    %c0_97 = arith.constant 0 : index
    %153 = vector.load %arg4[%c0_96, %c0_97] : memref<1x32xf32, #tpu.memory_space<vmem>>, vector<1x32xf32>
    %154 = vector.broadcast %153 : vector<1x32xf32> to vector<16x32xf32>
    %155 = arith.addf %152, %154 : vector<16x32xf32>
    %156 = vector.shape_cast %155 : vector<16x32xf32> to vector<2x8x32xf32>
    %c0_98 = arith.constant 0 : index
    %c0_99 = arith.constant 0 : index
    %c0_100 = arith.constant 0 : index
    %157 = vector.load %arg5[%c0_98, %c0_99, %c0_100] : memref<2x8x32xf32, #tpu.memory_space<vmem>>, vector<2x8x32xf32>
    tpu.vector_store %arg5[%c0_98, %c0_99, %c0_100], %156 {strides = array<i32>} : memref<2x8x32xf32, #tpu.memory_space<vmem>>, vector<2x8x32xf32>,
    return
  }
  func.func @transform_0(%arg0: i32) -> (i32, i32, i32) {
    %c0_i32 = arith.constant 0 : i32
    %c0_i32_0 = arith.constant 0 : i32
    %c0_i32_1 = arith.constant 0 : i32
    return %arg0, %c0_i32, %c0_i32_0 : i32, i32, i32
  }
  func.func @transform_1(%arg0: i32) -> (i32, i32) {
    %c0_i32 = arith.constant 0 : i32
    %c0_i32_0 = arith.constant 0 : i32
    %c0_i32_1 = arith.constant 0 : i32
    return %c0_i32, %c0_i32_0 : i32, i32
  }
  func.func @transform_2(%arg0: i32) -> (i32, i32) {
    %c0_i32 = arith.constant 0 : i32
    %c0_i32_0 = arith.constant 0 : i32
    %c0_i32_1 = arith.constant 0 : i32
    return %c0_i32, %c0_i32_0 : i32, i32
  }
  func.func @transform_3(%arg0: i32) -> (i32, i32) {
    %c0_i32 = arith.constant 0 : i32
    %c0_i32_0 = arith.constant 0 : i32
    %c0_i32_1 = arith.constant 0 : i32
    return %c0_i32, %c0_i32_0 : i32, i32
  }
  func.func @transform_4(%arg0: i32) -> (i32, i32, i32) {
    %c0_i32 = arith.constant 0 : i32
    %c0_i32_0 = arith.constant 0 : i32
    %c0_i32_1 = arith.constant 0 : i32
    return %arg0, %c0_i32, %c0_i32_0 : i32, i32, i32
  }
}

</mosaic_0001>

<bundles_post_ra>
// kernel: tpu_custom_call.1
= control target key start
LH: loop header
LB: loop body
LE: loop exit
PB: predicated region body
PF: predicated region fallthrough
CT: control target
= control target key end

     0   :  { %9 = vsyncpa [#allocation5], 0  ;;  %s1815_s0 = inlined_call_operand.hbm [shape: bf16[2,8,32], index: 0, kind: input, shape index: {}]   ;;  %s1816_s1 = inlined_call_operand.hbm [shape: bf16[32,96], index: 1, kind: input, shape index: {}]   ;;  %s1817_s2 = inlined_call_operand.hbm [shape: bf16[32,32], index: 2, kind: input, shape index: {}]   ;;  %s1818_s3 = inlined_call_operand.vmem [shape: f32[1,32], index: 3, kind: input, shape index: {}]   ;;  %s1819_s4 = inlined_call_operand.hbm [shape: f32[2,8,32], index: 4, kind: output, shape index: {}]  }
   0x1   :  { %10 = vsyncpa [#allocation8], 0 }
   0x2   :  { %11 = vsyncpa [#allocation6], 0  ;;  %s1498_s15 = smov [#allocation7]   ;;  %s1499_s17 = smov [#allocation4]  }
   0x3   :  { %s29_s16 = sshll.u32 %s1498_s15, 4  ;;  %s17_s18 = sshll.u32 %s1499_s17, 4  ;;  %s30_s16 = int_to_ptr.vmem [resolvable:$true] %s29_s16  ;;  %s1545_s18 = int_to_ptr.vmem [resolvable:$true] %s17_s18 }
   0x4   :  { %s1404_s21 = scalar_lea.hbm %s1816_s1, 256 }
   0x5   :  { %p1405_p0 = scmp.ne.s32.totalorder %s1816_s1, %s1404_s21  ;;  %p1408_p1 = scmp.lt.u32.totalorder %s1404_s21, %s1816_s1 }
   0x7   :  { %p1410_p2 = pnand %p1408_p1, %p1405_p0 }
   0x9   :  { %1413 = shalt.err (!%p1410_p2)
}
   0xa   :  { %s1414_s26 = scalar_lea.vmem %s30_s16, 256  ;;  %p1419_p4 = scmp.lt.s32.totalorder %s30_s16, %s30_s16 }
   0xb   :  { %p1415_p3 = scmp.ne.s32.totalorder %s30_s16, %s1414_s26  ;;  %p1420_p5 = scmp.lt.s32.totalorder %s1414_s26, %s1414_s26 }
   0xd   :  { %p1421_p6 = por %p1420_p5, %p1419_p4 }
   0xf   :  { %p1422_p7 = pnand %p1421_p6, %p1415_p3 }
  0x11   :  { %1425 = shalt.err (!%p1422_p7)
}
  0x12   :  { %s1500_s27 = smov 64   ;;  %s1501_s28 = smov 4  }
  0x13   :  { %35 = dma.hbm_to_vmem [thread:$0]  %s1816_s1, 256, %s30_s16, [#allocation8], %s1500_s27, %s1500_s27, %s1501_s28  }
  0x14   :  { %s1426_s7 = scalar_lea.hbm %s1815_s0, 128 }
  0x15   :  { %p1427_p8 = scmp.ne.s32.totalorder %s1815_s0, %s1426_s7  ;;  %p1430_p9 = scmp.lt.u32.totalorder %s1426_s7, %s1815_s0 }
  0x17   :  { %p1432_p10 = pnand %p1430_p9, %p1427_p8 }
  0x19   :  { %1435 = shalt.err (!%p1432_p10)
}
  0x1a   :  { %s1436_s12 = scalar_lea.vmem %s1545_s18, 128  ;;  %p1441_p12 = scmp.lt.s32.totalorder %s1545_s18, %s1545_s18 }
  0x1b   :  { %p1437_p11 = scmp.ne.s32.totalorder %s1545_s18, %s1436_s12  ;;  %p1442_p13 = scmp.lt.s32.totalorder %s1436_s12, %s1436_s12 }
  0x1d   :  { %p1443_p0 = por %p1442_p13, %p1441_p12 }
  0x1f   :  { %p1444_p1 = pnand %p1443_p0, %p1437_p11 }
  0x21   :  { %1447 = shalt.err (!%p1444_p1)
}
  0x22   :  { %23 = dma.hbm_to_vmem [thread:$0]  %s1815_s0, 128, %s1545_s18, [#allocation5], %s1500_s27, %s1500_s27, %s1501_s28  }
  0x23   :  { %s1502_s14 = smov [#allocation9]   ;;  %s1448_s19 = scalar_lea.hbm %s1817_s2, 256 }
  0x24   :  { %s41_s15 = sshll.u32 %s1502_s14, 4  ;;  %p1449_p2 = scmp.ne.s32.totalorder %s1817_s2, %s1448_s19  ;;  %s42_s15 = int_to_ptr.vmem [resolvable:$true] %s41_s15 }
  0x25   :  { %p1452_p3 = scmp.lt.u32.totalorder %s1448_s19, %s1817_s2 }
  0x27   :  { %p1454_p4 = pnand %p1452_p3, %p1449_p2 }
  0x29   :  { %1457 = shalt.err (!%p1454_p4)
}
  0x2a   :  { %s1458_s24 = scalar_lea.vmem %s42_s15, 256  ;;  %p1463_p6 = scmp.lt.s32.totalorder %s42_s15, %s42_s15 }
  0x2b   :  { %p1459_p5 = scmp.ne.s32.totalorder %s42_s15, %s1458_s24  ;;  %p1464_p7 = scmp.lt.s32.totalorder %s1458_s24, %s1458_s24 }
  0x2d   :  { %p1465_p8 = por %p1464_p7, %p1463_p6 }
  0x2f   :  { %p1466_p9 = pnand %p1465_p8, %p1459_p5 }
  0x31   :  { %1469 = shalt.err (!%p1466_p9)
}
  0x32   :  { %47 = dma.hbm_to_vmem [thread:$0]  %s1817_s2, 256, %s42_s15, [#allocation8], %s1500_s27, %s1500_s27, %s1501_s28  }
  0x33   :  { %1492 = dma.done.wait [#allocation5], 128  }
  0x34   :  { %1493 = vsyncadd [#allocation5], 4294967168 }
  0x35   :  { %1494 = dma.done.wait [#allocation8], 512  }
  0x36   :  { %1495 = vsyncadd [#allocation8], 4294966784  ;;  %v1503_v0 = vmov 0.0   ;;  %vm1504_vm0 = vmmov 0   ;;  %v1367_v1 = vld [vmem:[#allocation7] sm:$0xff]   ;;  %v1368_v2 = vld [vmem:[#allocation7 + $0x8] sm:$0xff]  }
  0x37   :  { %1233 = vmatprep.subr.bf16.mxu0 %v1503_v0  ;;  %1237 = vmatprep.mubr.msk.bf16.mxu0 %vm1504_vm0, %v1503_v0  ;;  %v1369_v3 = vld [vmem:[#allocation4] sm:$0xff]   ;;  %vm83_vm1 = vcmask 261120   ;;  %vm129_vm2 = vcmask 785408   ;;  %s1505_s2 = smov 120   ;;  %s1506_s25 = smov 96   ;;  %vm135_vm3 = vcmask 64512  }
  0x38   :  { %1241 = vmatprep.subr.bf16.mxu1 %v1503_v0  ;;  %1243 = vmatprep.mubr.msk.bf16.mxu1 %vm1504_vm0, %v1503_v0  ;;  %s1507_s26 = smov 80   ;;  %s1508_s28 = smov 88   ;;  %vm199_vm4 = vcmask 1043456   ;;  %vm244_vm5 = vcmask 60416   ;;  %vm718_vm6 = vcmask 64516   ;;  %vm363_vm7 = vcmask 126016  }
  0x39   :  { %1234 = vmatpush3.bf16.msra.mxu0 %v1367_v1  ;;  %s1509_s29 = smov 72   ;;  %s1510_s30 = smov 112   ;;  %vm482_vm8 = vcmask 191616   ;;  %vm601_vm9 = vcmask 257216   ;;  %vm839_vm10 = vcmask 130116   ;;  %vm960_vm11 = vcmask 195716  }
  0x3a   :  { %1235 = vmatprep.subr.bf16.mxu0 %v1503_v0  ;;  %s1511_s5 = smov 104   ;;  %s1512_s6 = smov 56   ;;  %vm1081_vm12 = vcmask 261316  }
  0x3b   :  { %s1513_s7 = smov 48   ;;  %s1514_s8 = smov 40  }
  0x3c   :  { %s1516_s9 = smov 16   ;;  %s1517_s10 = smov 24  }
  0x3d   :  { %1236 = vmatpush3.bf16.msra.mxu0 %v1368_v2  ;;  %s1518_s1 = smov [#allocation10]  }
  0x3e   :  { %1247 = vmatprep.subr.bf16.mxu0 %v1503_v0  ;;  %s1158_s13 = sshll.u32 %s1518_s1, 4  ;;  %s1159_s13 = int_to_ptr.vmem [resolvable:$true] %s1158_s13 }
  0x3f   :  { %s1470_s14 = scalar_lea.vmem %s1159_s13, 256  ;;  %p1475_p11 = scmp.lt.s32.totalorder %s1159_s13, %s1159_s13 }
  0x40   :  { %1238 = vmatmul.mubr.msk.bf16.vlgmr.msra.gmra.mrb[0].mxu0 %vm83_vm1, %v1369_v3  ;;  %p1471_p10 = scmp.ne.s32.totalorder %s1159_s13, %s1470_s14  ;;  %p1476_p12 = scmp.lt.s32.totalorder %s1470_s14, %s1470_s14 }
  0x41   :  { %1249 = vmatprep.mubr.msk.bf16.mxu0 %vm1504_vm0, %v1503_v0 }
  0x42   :  { %p1477_p13 = por %p1476_p12, %p1475_p11 }
  0x44   :  { %p1478_p0 = pnand %p1477_p13, %p1471_p10 }
 0x113   :  { %v121_v4 = vpop.f32.mrb[0].mxu0 }
 0x114   :  { %v1239_v5 = vpop.f32.mrb[1].mxu0 }
 0x115   :  { %v124_v6 = vpop.f32.mrb[2].mxu0 }
 0x116   :  { %v128_v7 = vpack.c.bf16 %v124_v6, %v121_v4  ;;  %v1240_v8 = vpop.f32.mrb[3].mxu0 }
 0x118   :  { %130 = vst.msk [vmem:[#allocation2] sm:$0xff] %vm129_vm2, %v128_v7 }
 0x11f   :  { %v1608_v9 = vld [vmem:[#allocation2] sm:$0xf]  ;;  %v603_v13 = vld [vmem:[#allocation2] sm:$0xf0] }
 0x120   :  { %v1610_v10 = vld [vmem:[#allocation2] sm:$0xf]  ;;  %248 = vrot.lane.b32.xlu1 %v1608_v9, %s1505_s2  ;;  %v1622_v14 = vrot.slane %v603_v13, 4  ;;  %v720_v15 = vld [vmem:[#allocation2] sm:$0xf0] }
 0x121   :  { %133 = vrot.lane.b32.xlu0 %v1610_v10, %s1506_s25  ;;  %v1614_v11 = vld [vmem:[#allocation2] sm:$0xf]  ;;  %v1626_v16 = vrot.slane %v720_v15, 4  ;;  %v841_v17 = vld [vmem:[#allocation2] sm:$0xf0] }
 0x122   :  { %v1618_v12 = vld [vmem:[#allocation2] sm:$0xf]  ;;  %v1630_v18 = vrot.slane %v841_v17, 4  ;;  %v962_v19 = vld [vmem:[#allocation2] sm:$0xf0] }
 0x123   :  { %v1634_v20 = vrot.slane %v962_v19, 4 }
 0x124   :  { %369 = vrot.lane.b32.xlu1 %v1614_v11, %s1507_s26 }
 0x125   :  { %250 = vrot.lane.b32.xlu0 %v1608_v9, %s1508_s28 }
 0x128   :  { %488 = vrot.lane.b32.xlu1 %v1618_v12, %s1509_s29 }
 0x129   :  { %367 = vrot.lane.b32.xlu0 %v1614_v11, %s1510_s30 }
 0x12c   :  { %606 = vrot.lane.b32.xlu1 %v1622_v14, %s1506_s25 }
 0x12d   :  { %486 = vrot.lane.b32.xlu0 %v1618_v12, %s1511_s5 }
 0x130   :  { %723 = vrot.lane.b32.xlu1 %v1626_v16, %s1505_s2 }
 0x131   :  { %725 = vrot.lane.b32.xlu0 %v1626_v16, %s1508_s28 }
 0x134   :  { %844 = vrot.lane.b32.xlu1 %v1630_v18, %s1510_s30 }
 0x135   :  { %846 = vrot.lane.b32.xlu0 %v1630_v18, %s1507_s26 }
 0x138   :  { %965 = vrot.lane.b32.xlu1 %v1634_v20, %s1511_s5 }
 0x139   :  { %967 = vrot.lane.b32.xlu0 %v1634_v20, %s1509_s29 }
 0x192   :  { %v249_v24 = vpop.permute.xlu1 %248 }
 0x193   :  { %v134_v21 = vpop.permute.xlu0 %133 }
 0x194   :  { %v140_v22 = vsel %vm135_vm3, %v134_v21, 0 }
 0x195   :  { %1242 = vmatpush3.bf16.xpose.msra.mxu1 %v140_v22 }
 0x196   :  { %1253 = vmatprep.subr.bf16.mxu1 %v1503_v0  ;;  %v370_v26 = vpop.permute.xlu1 %369 }
 0x197   :  { %v251_v23 = vpop.permute.xlu0 %250  ;;  %v375_v27 = vsel %vm135_vm3, %v370_v26, 0 }
 0x198   :  { %v256_v25 = vsel %vm135_vm3, %v251_v23, 0 }
 0x19a   :  { %v489_v28 = vpop.permute.xlu1 %488 }
 0x19b   :  { %v368_v29 = vpop.permute.xlu0 %367  ;;  %v494_v30 = vsel %vm135_vm3, %v489_v28, 0 }
 0x19c   :  { %1244 = vmatmul.mubr.msk.bf16.vlgmr.msra.gmra.mrb[0].mxu1 %vm135_vm3, %v1610_v10 }
 0x19d   :  { %1254 = vmatpush3.bf16.xpose.msra.mxu1 %v256_v25  ;;  %1255 = vmatprep.mubr.msk.bf16.mxu1 %vm1504_vm0, %v1503_v0 }
 0x19e   :  { %1265 = vmatprep.subr.bf16.mxu1 %v1503_v0  ;;  %v607_v31 = vpop.permute.xlu1 %606 }
 0x19f   :  { %v487_v32 = vpop.permute.xlu0 %486  ;;  %v612_v33 = vsel %vm135_vm3, %v607_v31, 0 }
 0x1a2   :  { %v724_v37 = vpop.permute.xlu1 %723 }
 0x1a3   :  { %v726_v34 = vpop.permute.xlu0 %725 }
 0x1a4   :  { %1256 = vmatmul.mubr.msk.bf16.vlgmr.msra.gmra.mrb[4].mxu1 %vm135_vm3, %v249_v24  ;;  %v731_v35 = vsel %vm135_vm3, %v726_v34, 0 }
 0x1a5   :  { %1266 = vmatpush3.bf16.xpose.msra.mxu1 %v375_v27  ;;  %1267 = vmatprep.mubr.msk.bf16.mxu1 %vm1504_vm0, %v1503_v0 }
 0x1a6   :  { %1277 = vmatprep.subr.bf16.mxu1 %v1503_v0  ;;  %v845_v40 = vpop.permute.xlu1 %844 }
 0x1a7   :  { %v847_v36 = vpop.permute.xlu0 %846 }
 0x1a8   :  { %v852_v38 = vsel %vm135_vm3, %v847_v36, 0 }
 0x1aa   :  { %v966_v42 = vpop.permute.xlu1 %965 }
 0x1ab   :  { %v968_v39 = vpop.permute.xlu0 %967 }
 0x1ac   :  { %1268 = vmatmul.mubr.msk.bf16.vlgmr.msra.gmra.mrb[8].mxu1 %vm135_vm3, %v368_v29  ;;  %v973_v41 = vsel %vm135_vm3, %v968_v39, 0 }
 0x1ad   :  { %1278 = vmatpush3.bf16.xpose.msra.mxu1 %v494_v30  ;;  %1279 = vmatprep.mubr.msk.bf16.mxu1 %vm1504_vm0, %v1503_v0 }
 0x1ae   :  { %1289 = vmatprep.subr.bf16.mxu1 %v1503_v0 }
 0x1b4   :  { %1280 = vmatmul.mubr.msk.bf16.vlgmr.msra.gmra.mrb[12].mxu1 %vm135_vm3, %v487_v32 }
 0x1b5   :  { %1290 = vmatpush3.bf16.xpose.msra.mxu1 %v612_v33  ;;  %1291 = vmatprep.mubr.msk.bf16.mxu1 %vm1504_vm0, %v1503_v0 }
 0x1b6   :  { %1301 = vmatprep.subr.bf16.mxu1 %v1503_v0 }
 0x1bc   :  { %1292 = vmatmul.mubr.msk.bf16.vlgmr.msra.gmra.mrb[16].mxu1 %vm135_vm3, %v1622_v14 }
 0x1bd   :  { %1302 = vmatpush3.bf16.xpose.msra.mxu1 %v731_v35  ;;  %1303 = vmatprep.mubr.msk.bf16.mxu1 %vm1504_vm0, %v1503_v0 }
 0x1be   :  { %1313 = vmatprep.subr.bf16.mxu1 %v1503_v0 }
 0x1c4   :  { %1304 = vmatmul.mubr.msk.bf16.vlgmr.msra.gmra.mrb[20].mxu1 %vm135_vm3, %v724_v37 }
 0x1c5   :  { %1314 = vmatpush3.bf16.xpose.msra.mxu1 %v852_v38  ;;  %1315 = vmatprep.mubr.msk.bf16.mxu1 %vm1504_vm0, %v1503_v0 }
 0x1c6   :  { %1325 = vmatprep.subr.bf16.mxu1 %v1503_v0 }
 0x1cc   :  { %1316 = vmatmul.mubr.msk.bf16.vlgmr.msra.gmra.mrb[24].mxu1 %vm135_vm3, %v845_v40 }
 0x1cd   :  { %1326 = vmatpush3.bf16.xpose.msra.mxu1 %v973_v41  ;;  %1327 = vmatprep.mubr.msk.bf16.mxu1 %vm1504_vm0, %v1503_v0 }
 0x1ce   :  { %1337 = vmatprep.subr.bf16.mxu1 %v1503_v0 }
 0x1d4   :  { %1328 = vmatmul.mubr.msk.bf16.vlgmr.msra.gmra.mrb[28].mxu1 %vm135_vm3, %v966_v42 }
 0x1d5   :  { %1341 = vmatprep.mubr.msk.bf16.mxu1 %vm1504_vm0, %v1503_v0 }
 0x26f   :  { %v176_v43 = vpop.f32.mrb[0].mxu1 }
 0x270   :  { %v1245_v44 = vpop.f32.mrb[1].mxu1  ;;  %v182_v45 = vsel %vm135_vm3, %v176_v43, -inf }
 0x271   :  { %183 = vmax.xlane.f32.xlu0 %v182_v45  ;;  %v179_v46 = vpop.f32.mrb[2].mxu1 }
 0x272   :  { %v1246_v47 = vpop.f32.mrb[3].mxu1 }
 0x277   :  { %v292_v48 = vpop.f32.mrb[4].mxu1 }
 0x278   :  { %v1257_v49 = vpop.f32.mrb[5].mxu1  ;;  %v298_v50 = vsel %vm135_vm3, %v292_v48, -inf }
 0x279   :  { %299 = vmax.xlane.f32.xlu1 %v298_v50  ;;  %v295_v51 = vpop.f32.mrb[6].mxu1 }
 0x27a   :  { %v1258_v52 = vpop.f32.mrb[7].mxu1 }
 0x27f   :  { %v411_v53 = vpop.f32.mrb[8].mxu1 }
 0x280   :  { %v1269_v54 = vpop.f32.mrb[9].mxu1  ;;  %v417_v55 = vsel %vm135_vm3, %v411_v53, -inf }
 0x281   :  { %418 = vmax.xlane.f32.xlu0 %v417_v55  ;;  %v414_v56 = vpop.f32.mrb[10].mxu1 }
 0x282   :  { %v1270_v57 = vpop.f32.mrb[11].mxu1 }
 0x287   :  { %v1683_v58 = vpop.f32.mrb[12].mxu1 }
 0x288   :  { %v1281_v59 = vpop.f32.mrb[13].mxu1  ;;  %v536_v60 = vsel %vm135_vm3, %v1683_v58, -inf }
 0x289   :  { %537 = vmax.xlane.f32.xlu0 %v536_v60  ;;  %v533_v61 = vpop.f32.mrb[14].mxu1 }
 0x28a   :  { %v1282_v62 = vpop.f32.mrb[15].mxu1 }
 0x28f   :  { %v1687_v63 = vpop.f32.mrb[16].mxu1 }
 0x290   :  { %v1293_v1 = vpop.f32.mrb[17].mxu1  ;;  %v654_v2 = vsel %vm135_vm3, %v1687_v63, -inf }
 0x291   :  { %655 = vmax.xlane.f32.xlu1 %v654_v2  ;;  %v651_v3 = vpop.f32.mrb[18].mxu1 }
 0x292   :  { %v1294_v4 = vpop.f32.mrb[19].mxu1 }
 0x297   :  { %v767_v5 = vpop.f32.mrb[20].mxu1 }
 0x298   :  { %v1305_v6 = vpop.f32.mrb[21].mxu1  ;;  %v773_v7 = vsel %vm135_vm3, %v767_v5, -inf }
 0x299   :  { %774 = vmax.xlane.f32.xlu0 %v773_v7  ;;  %v770_v8 = vpop.f32.mrb[22].mxu1 }
 0x29a   :  { %v1306_v13 = vpop.f32.mrb[23].mxu1 }
 0x29f   :  { %v888_v15 = vpop.f32.mrb[24].mxu1 }
 0x2a0   :  { %v1317_v17 = vpop.f32.mrb[25].mxu1  ;;  %v894_v19 = vsel %vm135_vm3, %v888_v15, -inf }
 0x2a1   :  { %895 = vmax.xlane.f32.xlu1 %v894_v19  ;;  %v891_v21 = vpop.f32.mrb[26].mxu1 }
 0x2a2   :  { %v1318_v22 = vpop.f32.mrb[27].mxu1 }
 0x2a7   :  { %v1693_v23 = vpop.f32.mrb[28].mxu1 }
 0x2a8   :  { %v1329_v24 = vpop.f32.mrb[29].mxu1  ;;  %v1015_v27 = vsel %vm135_vm3, %v1693_v23, -inf }
 0x2a9   :  { %v1012_v25 = vpop.f32.mrb[30].mxu1 }
 0x2aa   :  { %v1330_v26 = vpop.f32.mrb[31].mxu1 }
 0x2af   :  { %310 = vrot.lane.b32.xlu0 %v1608_v9, %s1512_s6 }
 0x2b2   :  { %194 = vrot.lane.b32.xlu1 %v1610_v10, %s1500_s27 }
 0x2ce   :  { %1016 = vmax.xlane.f32.xlu0 %v1015_v27 }
 0x2fe   :  { %v184_v28 = vpop.xlane.xlu0 %183 }
 0x2ff   :  { %v185_v29 = vsub.f32 %v176_v43, %v184_v28 }
 0x301   :  { %v186_v30 = vmul.f32 1.442695, %v185_v29 }
 0x303   :  { %1372 = vpow2.f32 %v186_v30 }
 0x306   :  { %v300_v31 = vpop.xlane.xlu1 %299 }
 0x307   :  { %v301_v32 = vsub.f32 %v292_v48, %v300_v31 }
 0x309   :  { %v302_v33 = vmul.f32 1.442695, %v301_v32 }
 0x30b   :  { %1374 = vpow2.f32 %v302_v33 }
 0x30d   :  { %v1701_v34 = vpop.eup %1372 }
 0x30e   :  { %v419_v35 = vpop.xlane.xlu0 %418  ;;  %v188_v9 = vsel %vm135_vm3, %v1701_v34, 0.0 }
 0x30f   :  { %v420_v36 = vsub.f32 %v411_v53, %v419_v35  ;;  %189 = vadd.xlane.f32.xlu1 %v188_v9 }
 0x311   :  { %v421_v10 = vmul.f32 1.442695, %v420_v36 }
 0x313   :  { %1376 = vpow2.f32 %v421_v10 }
 0x315   :  { %v1705_v37 = vpop.eup %1374 }
 0x316   :  { %v304_v38 = vsel %vm135_vm3, %v1705_v37, 0.0  ;;  %v538_v44 = vpop.xlane.xlu0 %537 }
 0x317   :  { %305 = vadd.xlane.f32.xlu0 %v304_v38  ;;  %v539_v46 = vsub.f32 %v1683_v58, %v538_v44 }
 0x319   :  { %v540_v47 = vmul.f32 1.442695, %v539_v46 }
 0x31b   :  { %1378 = vpow2.f32 %v540_v47 }
 0x31d   :  { %v1709_v39 = vpop.eup %1376 }
 0x31e   :  { %v423_v40 = vsel %vm135_vm3, %v1709_v39, 0.0  ;;  %v656_v41 = vpop.xlane.xlu1 %655 }
 0x31f   :  { %424 = vadd.xlane.f32.xlu1 %v423_v40  ;;  %v657_v48 = vsub.f32 %v1687_v63, %v656_v41 }
 0x321   :  { %v658_v50 = vmul.f32 1.442695, %v657_v48 }
 0x323   :  { %1380 = vpow2.f32 %v658_v50 }
 0x325   :  { %v1379_v53 = vpop.eup %1378 }
 0x326   :  { %v775_v49 = vpop.xlane.xlu0 %774  ;;  %v542_v54 = vsel %vm135_vm3, %v1379_v53, 0.0 }
 0x32a   :  { %v311_v61 = vpop.permute.xlu0 %310 }
 0x32b   :  { %v316_v7 = vsel %vm199_vm4, %v311_v61, 0 }
 0x32d   :  { %429 = vrot.lane.b32.xlu0 %v1614_v11, %s1513_s7  ;;  %v776_v11 = vsub.f32 %v767_v5, %v775_v49  ;;  %v1722_v55 = vpop.eup %1380 }
 0x32e   :  { %v896_v42 = vpop.xlane.xlu1 %895  ;;  %v660_v57 = vsel %vm135_vm3, %v1722_v55, 0.0 }
 0x32f   :  { %v897_v51 = vsub.f32 %v888_v15, %v896_v42  ;;  %v777_v52 = vmul.f32 1.442695, %v776_v11 }
 0x330   :  { %548 = vrot.lane.b32.xlu1 %v1618_v12, %s1514_s8 }
 0x331   :  { %v898_v12 = vmul.f32 1.442695, %v897_v51  ;;  %1382 = vpow2.f32 %v777_v52 }
 0x332   :  { %v195_v43 = vpop.permute.xlu1 %194 }
 0x333   :  { %v201_v45 = vsel %vm199_vm4, %v195_v43, 0  ;;  %1384 = vpow2.f32 %v898_v12 }
 0x334   :  { %1248 = vmatpush3.bf16.msra.mxu0 %v201_v45 }
 0x335   :  { %1259 = vmatprep.subr.bf16.mxu0 %v1503_v0 }
 0x33b   :  { %v1724_v56 = vpop.eup %1382 }
 0x33c   :  { %v779_v60 = vsel %vm135_vm3, %v1724_v56, 0.0 }
 0x33d   :  { %v1728_v58 = vpop.eup %1384 }
 0x33e   :  { %v900_v59 = vsel %vm135_vm3, %v1728_v58, 0.0 }
 0x34c   :  { %543 = vadd.xlane.f32.xlu0 %v542_v54 }
 0x350   :  { %661 = vadd.xlane.f32.xlu0 %v660_v57 }
 0x354   :  { %901 = vadd.xlane.f32.xlu0 %v900_v59  ;;  %780 = vadd.xlane.f32.xlu1 %v779_v60 }
 0x35b   :  { %v1017_v62 = vpop.xlane.xlu0 %1016 }
 0x35c   :  { %v1018_v63 = vsub.f32 %v1693_v23, %v1017_v62 }
 0x35e   :  { %v1019_v1 = vmul.f32 1.442695, %v1018_v63 }
 0x360   :  { %1386 = vpow2.f32 %v1019_v1 }
 0x365   :  { %785 = vrot.lane.b32.xlu1 %v1626_v16, %s1512_s6 }
 0x369   :  { %906 = vrot.lane.b32.xlu1 %v1630_v18, %s1513_s7 }
 0x36a   :  { %v1739_v2 = vpop.eup %1386 }
 0x36b   :  { %v1021_v3 = vsel %vm135_vm3, %v1739_v2, 0.0 }
 0x36c   :  { %1022 = vadd.xlane.f32.xlu0 %v1021_v3 }
 0x36d   :  { %1027 = vrot.lane.b32.xlu1 %v1634_v20, %s1514_s8 }
 0x382   :  { %666 = vrot.lane.b32.xlu0 %v1622_v14, %s1500_s27  ;;  %s1515_s27 = smov 8  }
 0x39c   :  { %v190_v4 = vpop.xlane.xlu1 %189 }
 0x39d   :  { %1388 = vrcp.f32 %v190_v4 }
 0x3a4   :  { %v306_v5 = vpop.xlane.xlu0 %305 }
 0x3a5   :  { %1390 = vrcp.f32 %v306_v5 }
 0x3a7   :  { %v1389_v16 = vpop.eup %1388 }
 0x3a8   :  { %v192_v6 = vmul.f32 %v1389_v16, %v1701_v34  ;;  %v430_v13 = vpop.permute.xlu0 %429 }
 0x3a9   :  { %v435_v17 = vsel %vm199_vm4, %v430_v13, 0 }
 0x3aa   :  { %v193_v18 = vpack.c.bf16 %v192_v6, %v192_v6 }
 0x3ac   :  { %1250 = vmatmul.mubr.msk.bf16.vlgmr.msra.gmra.mrb[4].mxu0 %vm135_vm3, %v193_v18  ;;  %v425_v8 = vpop.xlane.xlu1 %424 }
 0x3ad   :  { %1392 = vrcp.f32 %v425_v8  ;;  %1260 = vmatpush3.bf16.msra.mxu0 %v316_v7  ;;  %1261 = vmatprep.mubr.msk.bf16.mxu0 %vm1504_vm0, %v1503_v0 }
 0x3ae   :  { %1271 = vmatprep.subr.bf16.mxu0 %v1503_v0 }
 0x3af   :  { %v1391_v14 = vpop.eup %1390 }
 0x3b0   :  { %v308_v20 = vmul.f32 %v1391_v14, %v1705_v37  ;;  %v549_v22 = vpop.permute.xlu1 %548 }
 0x3b1   :  { %v554_v24 = vsel %vm199_vm4, %v549_v22, 0 }
 0x3b2   :  { %v309_v15 = vpack.c.bf16 %v308_v20, %v308_v20 }
 0x3b4   :  { %1262 = vmatmul.mubr.msk.bf16.vlgmr.msra.gmra.mrb[8].mxu0 %vm135_vm3, %v309_v15 }
 0x3b5   :  { %1272 = vmatpush3.bf16.msra.mxu0 %v435_v17  ;;  %1273 = vmatprep.mubr.msk.bf16.mxu0 %vm1504_vm0, %v1503_v0 }
 0x3b6   :  { %1283 = vmatprep.subr.bf16.mxu0 %v1503_v0 }
 0x3b7   :  { %v1393_v19 = vpop.eup %1392 }
 0x3b8   :  { %v427_v21 = vmul.f32 %v1393_v19, %v1709_v39 }
 0x3ba   :  { %v428_v23 = vpack.c.bf16 %v427_v21, %v427_v21 }
 0x3bc   :  { %1274 = vmatmul.mubr.msk.bf16.vlgmr.msra.gmra.mrb[12].mxu0 %vm135_vm3, %v428_v23  ;;  %v1370_v23 = vld [vmem:[#allocation9] sm:$0xff]  }
 0x3bd   :  { %1284 = vmatpush3.bf16.msra.mxu0 %v554_v24  ;;  %1285 = vmatprep.mubr.msk.bf16.mxu0 %vm1504_vm0, %v1503_v0 }
 0x3be   :  { %1295 = vmatprep.subr.bf16.mxu0 %v1503_v0  ;;  %1338 = vmatpush3.bf16.msra.mxu1 %v1370_v23 }
 0x3bf   :  { %1339 = vmatprep.subr.bf16.mxu1 %v1503_v0 }
 0x3d9   :  { %v544_v25 = vpop.xlane.xlu0 %543 }
 0x3da   :  { %1394 = vrcp.f32 %v544_v25 }
 0x3dd   :  { %v662_v29 = vpop.xlane.xlu0 %661 }
 0x3de   :  { %1396 = vrcp.f32 %v662_v29 }
 0x3e1   :  { %v781_v30 = vpop.xlane.xlu1 %780  ;;  %v902_v31 = vpop.xlane.xlu0 %901 }
 0x3e2   :  { %1398 = vrcp.f32 %v781_v30 }
 0x3e3   :  { %1400 = vrcp.f32 %v902_v31 }
 0x3e4   :  { %v1395_v26 = vpop.eup %1394 }
 0x3e5   :  { %v546_v27 = vmul.f32 %v1395_v26, %v1379_v53  ;;  %v786_v36 = vpop.permute.xlu1 %785 }
 0x3e6   :  { %v791_v38 = vsel %vm199_vm4, %v786_v36, 0 }
 0x3e7   :  { %v547_v28 = vpack.c.bf16 %v546_v27, %v546_v27  ;;  %v1371_v27 = vld [vmem:[#allocation9 + $0x8] sm:$0xff]  }
 0x3e8   :  { %v1397_v32 = vpop.eup %1396  ;;  %1340 = vmatpush3.bf16.msra.mxu1 %v1371_v27 }
 0x3e9   :  { %1286 = vmatmul.mubr.msk.bf16.vlgmr.msra.gmra.mrb[16].mxu0 %vm135_vm3, %v547_v28  ;;  %v664_v34 = vmul.f32 %v1397_v32, %v1722_v55  ;;  %v907_v40 = vpop.permute.xlu1 %906 }
 0x3ea   :  { %1297 = vmatprep.mubr.msk.bf16.mxu0 %vm1504_vm0, %v1503_v0  ;;  %v912_v43 = vsel %vm199_vm4, %v907_v40, 0  ;;  %v1191_v40 = vld [vmem:[%s1818_s3] ss:$0 sm:$0xff] }
 0x3eb   :  { %v665_v10 = vpack.c.bf16 %v664_v34, %v664_v34 }
 0x3ec   :  { %v1399_v37 = vpop.eup %1398 }
 0x3ed   :  { %v783_v39 = vmul.f32 %v1399_v37, %v1724_v56  ;;  %v1401_v42 = vpop.eup %1400  ;;  %v1028_v45 = vpop.permute.xlu1 %1027 }
 0x3ee   :  { %v904_v44 = vmul.f32 %v1401_v42, %v1728_v58  ;;  %v1033_v48 = vsel %vm199_vm4, %v1028_v45, 0 }
 0x3ef   :  { %v784_v41 = vpack.c.bf16 %v783_v39, %v783_v39 }
 0x3f0   :  { %v905_v46 = vpack.c.bf16 %v904_v44, %v904_v44 }
 0x3f9   :  { %v1023_v33 = vpop.xlane.xlu0 %1022 }
 0x3fa   :  { %1402 = vrcp.f32 %v1023_v33 }
 0x3fd   :  { %v667_v35 = vpop.permute.xlu0 %666 }
 0x3fe   :  { %v672_v9 = vsel %vm199_vm4, %v667_v35, 0 }
 0x3ff   :  { %1296 = vmatpush3.bf16.msra.mxu0 %v672_v9 }
 0x400   :  { %1307 = vmatprep.subr.bf16.mxu0 %v1503_v0 }
 0x402   :  { %1298 = vmatmul.mubr.msk.bf16.vlgmr.msra.gmra.mrb[20].mxu0 %vm135_vm3, %v665_v10 }
 0x403   :  { %1308 = vmatpush3.bf16.msra.mxu0 %v791_v38  ;;  %1309 = vmatprep.mubr.msk.bf16.mxu0 %vm1504_vm0, %v1503_v0 }
 0x404   :  { %1319 = vmatprep.subr.bf16.mxu0 %v1503_v0  ;;  %v1403_v47 = vpop.eup %1402 }
 0x405   :  { %v1025_v49 = vmul.f32 %v1403_v47, %v1739_v2 }
 0x407   :  { %v1026_v11 = vpack.c.bf16 %v1025_v49, %v1025_v49 }
 0x40a   :  { %1310 = vmatmul.mubr.msk.bf16.vlgmr.msra.gmra.mrb[24].mxu0 %vm135_vm3, %v784_v41 }
 0x40b   :  { %1320 = vmatpush3.bf16.msra.mxu0 %v912_v43  ;;  %1321 = vmatprep.mubr.msk.bf16.mxu0 %vm1504_vm0, %v1503_v0 }
 0x40c   :  { %1331 = vmatprep.subr.bf16.mxu0 %v1503_v0 }
 0x412   :  { %1322 = vmatmul.mubr.msk.bf16.vlgmr.msra.gmra.mrb[28].mxu0 %vm135_vm3, %v905_v46 }
 0x413   :  { %1332 = vmatpush3.bf16.msra.mxu0 %v1033_v48  ;;  %1333 = vmatprep.mubr.msk.bf16.mxu0 %vm1504_vm0, %v1503_v0 }
 0x41a   :  { %1334 = vmatmul.mubr.msk.bf16.vlgmr.msra.gmra.mrb[32].mxu0 %vm135_vm3, %v1026_v11 }
 0x47f   :  { %v237_v50 = vpop.f32.mrb[4].mxu0 }
 0x480   :  { %v243_v51 = vpack.c.bf16 %v237_v50, %v237_v50  ;;  %v1251_v52 = vpop.f32.mrb[5].mxu0 }
 0x481   :  { %v240_v12 = vpop.f32.mrb[6].mxu0 }
 0x482   :  { %245 = vst.msk [vmem:[#allocation3] sm:$0xf] %vm244_vm5, %v243_v51  ;;  %v1252_v53 = vpop.f32.mrb[7].mxu0 }
 0x487   :  { %v352_v54 = vpop.f32.mrb[8].mxu0 }
 0x488   :  { %v358_v55 = vpack.c.bf16 %v352_v54, %v352_v54  ;;  %v1263_v56 = vpop.f32.mrb[9].mxu0 }
 0x489   :  { %v355_v57 = vpop.f32.mrb[10].mxu0 }
 0x48a   :  { %360 = vrot.lane.b32.xlu1 %v358_v55, %s1515_s27  ;;  %v1264_v58 = vpop.f32.mrb[11].mxu0 }
 0x48f   :  { %v471_v59 = vpop.f32.mrb[12].mxu0 }
 0x490   :  { %v477_v60 = vpack.c.bf16 %v471_v59, %v471_v59  ;;  %v1275_v61 = vpop.f32.mrb[13].mxu0 }
 0x491   :  { %v474_v62 = vpop.f32.mrb[14].mxu0 }
 0x492   :  { %479 = vrot.lane.b32.xlu0 %v477_v60, %s1516_s9  ;;  %v1276_v63 = vpop.f32.mrb[15].mxu0 }
 0x4bc   :  { %v590_v1 = vpop.f32.mrb[16].mxu0 }
 0x4bd   :  { %v596_v2 = vpack.c.bf16 %v590_v1, %v590_v1  ;;  %v1287_v3 = vpop.f32.mrb[17].mxu0 }
 0x4be   :  { %v593_v4 = vpop.f32.mrb[18].mxu0 }
 0x4bf   :  { %598 = vrot.lane.b32.xlu0 %v596_v2, %s1517_s10  ;;  %v1288_v5 = vpop.f32.mrb[19].mxu0 }
 0x4d5   :  { %v708_v16 = vpop.f32.mrb[20].mxu0 }
 0x4d6   :  { %v714_v6 = vpack.c.bf16 %v708_v16, %v708_v16  ;;  %v1299_v18 = vpop.f32.mrb[21].mxu0 }
 0x4d7   :  { %v711_v7 = vpop.f32.mrb[22].mxu0 }
 0x4d8   :  { %v716_v8 = vrot.slane %v714_v6, 4  ;;  %v1300_v14 = vpop.f32.mrb[23].mxu0 }
 0x4da   :  { %719 = vst.msk [vmem:[#allocation3] sm:$0xf0] %vm718_vm6, %v716_v8 }
 0x4dd   :  { %v827_v20 = vpop.f32.mrb[24].mxu0 }
 0x4de   :  { %v833_v13 = vpack.c.bf16 %v827_v20, %v827_v20  ;;  %v1311_v15 = vpop.f32.mrb[25].mxu0 }
 0x4df   :  { %v830_v17 = vpop.f32.mrb[26].mxu0 }
 0x4e0   :  { %v835_v19 = vrot.slane %v833_v13, 4  ;;  %v1312_v21 = vpop.f32.mrb[27].mxu0 }
 0x4e2   :  { %836 = vrot.lane.b32.xlu1 %v835_v19, %s1515_s27 }
 0x4e5   :  { %v948_v22 = vpop.f32.mrb[28].mxu0 }
 0x4e6   :  { %v954_v24 = vpack.c.bf16 %v948_v22, %v948_v22  ;;  %v1323_v25 = vpop.f32.mrb[29].mxu0 }
 0x4e7   :  { %v951_v26 = vpop.f32.mrb[30].mxu0 }
 0x4e8   :  { %v956_v28 = vrot.slane %v954_v24, 4  ;;  %v1324_v29 = vpop.f32.mrb[31].mxu0 }
 0x4ea   :  { %957 = vrot.lane.b32.xlu1 %v956_v28, %s1516_s9 }
 0x4ed   :  { %v1069_v30 = vpop.f32.mrb[32].mxu0 }
 0x4ee   :  { %v1075_v31 = vpack.c.bf16 %v1069_v30, %v1069_v30  ;;  %v1335_v32 = vpop.f32.mrb[33].mxu0 }
 0x4ef   :  { %v1072_v33 = vpop.f32.mrb[34].mxu0 }
 0x4f0   :  { %v1077_v34 = vrot.slane %v1075_v31, 4  ;;  %v1336_v35 = vpop.f32.mrb[35].mxu0 }
 0x4f2   :  { %1078 = vrot.lane.b32.xlu1 %v1077_v34, %s1517_s10 }
 0x4fc   :  { %v361_v9 = vpop.permute.xlu1 %360 }
 0x4fd   :  { %364 = vst.msk [vmem:[#allocation3] sm:$0xf] %vm363_vm7, %v361_v9 }
 0x504   :  { %v480_v36 = vpop.permute.xlu0 %479 }
 0x505   :  { %483 = vst.msk [vmem:[#allocation3] sm:$0xf] %vm482_vm8, %v480_v36 }
 0x531   :  { %v599_v10 = vpop.permute.xlu0 %598 }
 0x532   :  { %602 = vst.msk [vmem:[#allocation3] sm:$0xf] %vm601_vm9, %v599_v10 }
 0x554   :  { %v837_v0 = vpop.permute.xlu1 %836 }
 0x555   :  { %840 = vst.msk [vmem:[#allocation3] sm:$0xf0] %vm839_vm10, %v837_v0 }
 0x55c   :  { %v958_v37 = vpop.permute.xlu1 %957 }
 0x55d   :  { %961 = vst.msk [vmem:[#allocation3] sm:$0xf0] %vm960_vm11, %v958_v37 }
 0x564   :  { %v1079_v38 = vpop.permute.xlu1 %1078 }
 0x565   :  { %1082 = vst.msk [vmem:[#allocation3] sm:$0xf0] %vm1081_vm12, %v1079_v38 }
 0x56c   :  { %v1083_v39 = vld [vmem:[#allocation3] sm:$0xff] }
 0x56d   :  { %1342 = vmatmul.mubr.msk.bf16.vlgmr.msra.gmra.mrb[32].mxu1 %vm83_vm1, %v1083_v39 }
 0x640   :  { %v1144_v41 = vpop.f32.mrb[32].mxu1 }
 0x641   :  { %v1145_v42 = vadd.f32 %v1191_v40, %v1144_v41  ;;  %v1343_v43 = vpop.f32.mrb[33].mxu1 }
 0x642   :  { %v1147_v44 = vpop.f32.mrb[34].mxu1 }
 0x643   :  { %1151 = vst.msk [vmem:[#allocation10] sm:$0xff] %vm83_vm1, %v1145_v42  ;;  %v1148_v45 = vadd.f32 %v1191_v40, %v1147_v44  ;;  %v1344_v46 = vpop.f32.mrb[35].mxu1 }
 0x645   :  { %1152 = vst.msk [vmem:[#allocation10 + $0x8] sm:$0xff] %vm83_vm1, %v1148_v45 }
 0x646   :  { %1481 = shalt.err (!%p1478_p0)
}
 0x647   :  { %s1482_s16 = scalar_lea.hbm %s1819_s4, 256 }
 0x648   :  { %p1483_p1 = scmp.ne.s32.totalorder %s1819_s4, %s1482_s16  ;;  %p1486_p2 = scmp.lt.u32.totalorder %s1482_s16, %s1819_s4 }
 0x64a   :  { %p1488_p3 = pnand %p1486_p2, %p1483_p1 }
 0x64c   :  { %1491 = shalt.err (!%p1488_p3)
}
 0x64d   :  { %s1519_s22 = smov 128  }
 0x64e   :  { %1164 = dma.vmem_to_hbm [thread:$0]  %s1159_s13, 256, %s1819_s4, [#allocation6], %s1519_s22, %s1519_s22, %s1515_s27  }
 0x64f   :  { %1496 = dma.done.wait [#allocation6], 256  }
 0x650   :  { %1497 = vsyncadd [#allocation6], 4294967040 }
 0x651   :  { %1168 = vsyncpa [#allocation5], 1 }
 0x652   :  { %1169 = vsyncpa [#allocation8], 1 }
 0x653   :  { %1170 = vsyncpa [#allocation6], 1 }

</bundles_post_ra>
